<compile_context>
chip_gen: v6e
topology: v6e:2x2x1
jax: 0.10.0
libtpu: 0.0.40
codegen_flags: <defaults>
</compile_context>

<pallas_src>
from functools import partial

import jax
import jax.numpy as jnp
from jax.experimental import pallas as pl
from jax.experimental.pallas import tpu as pltpu

NEG_SLOPE = 0.01  # PyTorch nn.LeakyReLU default


def _softmax_last(x):
    m = jnp.max(x, axis=-1, keepdims=True)
    e = jnp.exp(x - m)
    # approx reciprocal rides the EUP slot (which already does the exp) instead
    # of a precise VALU divide; rel. error ~2^-12, well inside 1e-3 tolerance.
    return e * pl.reciprocal(jnp.sum(e, axis=-1, keepdims=True), approx=True)


def moe_kernel(
    x_ref,
    wx_ref, bx_ref, gw2_ref, gb2_ref, gw3_ref, gb3_ref, gw4_ref, gb4_ref,
    w2bd_ref, b2f_ref,
    seg_ref, segt_ref, red_ref,
    out_ref,
    *, gate_h1, num_experts,
):
    x = x_ref[...]                 # (T, in), bf16
    mm_dt = x.dtype                # matmul operand dtype

    # ---- fused first layer: gating L1 ++ all experts' L1 in ONE wide matmul -
    # wx = [gw1 | w1f]; both branches apply ReLU, then split at the 128-lane
    # boundary (free, vreg-aligned static slice).
    h_all = jnp.dot(x, wx_ref[...], preferred_element_type=jnp.float32) + bx_ref[...]
    h_all = jnp.maximum(h_all, 0.0)
    g_h = h_all[:, :gate_h1]       # (T, 128)    gating hidden
    h1 = h_all[:, gate_h1:]        # (T, E*hid)  expert hidden (all experts)

    # ---------------- gating network layers 2..4 + softmax -------------------
    h = jnp.dot(g_h.astype(mm_dt), gw2_ref[...],
                preferred_element_type=jnp.float32) + gb2_ref[...]
    h = jnp.where(h > 0, h, NEG_SLOPE * h)                     # LeakyReLU
    h = jnp.dot(h.astype(mm_dt), gw3_ref[...],
                preferred_element_type=jnp.float32) + gb3_ref[...]
    h = jnp.where(h > 0, h, NEG_SLOPE * h)                     # LeakyReLU
    logits = jnp.dot(h.astype(mm_dt), gw4_ref[...],
                     preferred_element_type=jnp.float32) + gb4_ref[...]
    gates = _softmax_last(logits)                              # (T, E), f32

    # ---------------- experts layer 2 (block-diagonal, one matmul) -----------
    lo = jnp.dot(h1.astype(mm_dt), w2bd_ref[...],
                 preferred_element_type=jnp.float32) + b2f_ref[...]   # (T, E*out)

    # ---------------- per-expert softmax + gate-weighted mix -----------------
    # Exact per-expert max stabilizer (masked VPU/XLU ops only, f32, no
    # reshape): every expert's exp block peaks at 1, so denom >= 1 and the
    # approx reciprocal can never blow up.
    segt_f32 = segt_ref[...].astype(jnp.float32)               # (E, E*out) 0/1
    m_lanes = jnp.zeros_like(lo)
    for e in range(num_experts):                               # tiny static unroll
        msk = segt_f32[e:e + 1, :]                             # (1, E*out)
        m_e = jnp.max(jnp.where(msk > 0, lo, -jnp.inf), axis=-1, keepdims=True)
        m_lanes = m_lanes + m_e * msk
    p = jnp.exp(lo - m_lanes)                                  # (T, E*out), <= 1

    #   seg  (E*out, E)      : column e sums the lanes of expert e
    #   segt (E, E*out)      : broadcasts a per-expert scalar back to its lanes
    #   red  (E*out, out_pad): lane (e*out + o) -> output lane o (zero padded)
    # All three are 0/1 -> exact in bf16 -> every dot is a native bf16 MXU op.
    denom = jnp.dot(p.astype(mm_dt), seg_ref[...],
                    preferred_element_type=jnp.float32)        # (T, E), >= 1
    g_over_d = gates * pl.reciprocal(denom, approx=True)       # (T, E)
    scale = jnp.dot(g_over_d.astype(mm_dt), segt_ref[...],
                    preferred_element_type=jnp.float32)        # (T, E*out)
    # Lane-dense (T, out_pad) store; padding lanes are exact zeros via `red`.
    out_ref[...] = jnp.dot((p * scale).astype(mm_dt), red_ref[...],
                           preferred_element_type=jnp.float32).astype(out_ref.dtype)


def pack_params(params, matmul_dtype=jnp.bfloat16, lane_pad=128):
    """Fuse weights, build 0/1 segment matrices (bf16), cast matmul weights."""
    (gw1, gb1, gw2, gb2, gw3, gb3, gw4, gb4, ew1, eb1, ew2, eb2) = params
    num_experts, in_dim, hid = ew1.shape
    out_dim = ew2.shape[-1]
    out_pad = ((out_dim + lane_pad - 1) // lane_pad) * lane_pad
    gate_h1 = gw1.shape[1]

    # Fused expert layer 1: (in, E*hid); column (e*hid + j) == ew1[e][:, j],
    # then column-concat with gating layer 1 -> one wide x-consuming matmul.
    w1f = jnp.transpose(ew1, (1, 0, 2)).reshape(in_dim, num_experts * hid)
    b1f = eb1.reshape(1, num_experts * hid)
    wx = jnp.concatenate([gw1, w1f], axis=1)        # (in, gate_h1 + E*hid)
    bx = jnp.concatenate([gb1, b1f], axis=1)        # (1,  gate_h1 + E*hid)

    # Fused expert layer 2: block-diagonal (E*hid, E*out)
    w2bd = jnp.zeros((num_experts * hid, num_experts * out_dim), jnp.float32)
    for e in range(num_experts):
        w2bd = w2bd.at[e * hid:(e + 1) * hid,
                       e * out_dim:(e + 1) * out_dim].set(ew2[e])
    b2f = eb2.reshape(1, num_experts * out_dim)

    # Constant 0/1 segment / reduction matrices.  bf16 is exact for 0/1, so
    # every epilogue matmul stays a native bf16 MXU op (no f32 emulation).
    lane_expert = jnp.arange(num_experts * out_dim) // out_dim
    lane_out = jnp.arange(num_experts * out_dim) % out_dim
    seg = (lane_expert[:, None] ==
           jnp.arange(num_experts)[None, :]).astype(matmul_dtype)
    segt = seg.T
    red = (lane_out[:, None] == jnp.arange(out_pad)[None, :]).astype(matmul_dtype)

    c = lambda w: w.astype(matmul_dtype)
    packed = (c(wx), bx, c(gw2), gb2, c(gw3), gb3, c(gw4), gb4,
              c(w2bd), b2f, seg, segt, red)
    meta = {"num_experts": num_experts, "output_dim": out_dim,
            "out_pad": out_pad, "gate_h1": gate_h1, "matmul_dtype": matmul_dtype}
    return packed, meta


def _tuning():
    """(tile cap, vmem budget) per TPU generation.

    v5e/v6e: 128 MiB physical VMEM -> bigger tiles + 64 MiB budget.
    v7x / unknown: conservative 512-row cap, 32 MiB (v7x VMEM is 64 MiB)."""
    try:
        kind = jax.devices()[0].device_kind.lower()
    except Exception:  # pragma: no cover
        kind = ""
    if ("v5" in kind) or ("v6" in kind):
        return 1024, 64 * 1024 * 1024
    return 512, 32 * 1024 * 1024


def _choose_tiling(batch, cap):
    """Pick (tile_b, padded_batch).

    Tiles are multiples of 16 rows (bf16 packs 16 rows per vreg sublane
    group); whenever the batch allows we emit >= 2 grid steps so a v7x chip
    can shard the 'parallel' axis across both TensorCores."""
    padded = ((batch + 15) // 16) * 16
    if padded <= 16:
        return padded, padded
    tile = min(cap, max(16, (padded // 2) // 16 * 16))
    padded = ((padded + tile - 1) // tile) * tile
    return tile, padded


def moe_forward(x, packed, meta):
    batch, in_dim = x.shape
    out_dim = meta["output_dim"]
    out_pad = meta["out_pad"]

    cap, vmem_limit = _tuning()
    tile_b, padded_batch = _choose_tiling(batch, cap)

    x = x.astype(meta["matmul_dtype"])
    if padded_batch != batch:
        x = jnp.pad(x, ((0, padded_batch - batch), (0, 0)))

    grid = (padded_batch // tile_b,)
    kernel = partial(moe_kernel, gate_h1=meta["gate_h1"],
                     num_experts=meta["num_experts"])

    x_spec = pl.BlockSpec((tile_b, in_dim), lambda i: (i, 0))
    # Weights / biases / segment matrices: full-array blocks with a constant
    # index map -> DMA'd once, VMEM-resident across the whole batch grid.
    w_specs = [pl.BlockSpec(w.shape, lambda i: (0, 0)) for w in packed]
    out_spec = pl.BlockSpec((tile_b, out_pad), lambda i: (i, 0))

    out_padded = pl.pallas_call(
        kernel,
        out_shape=jax.ShapeDtypeStruct((padded_batch, out_pad), jnp.float32),
        grid=grid,
        in_specs=[x_spec] + w_specs,
        out_specs=out_spec,
        compiler_params=pltpu.CompilerParams(
            dimension_semantics=("parallel",),
            vmem_limit_bytes=vmem_limit,
        ),
    )(x, *packed)
    return out_padded[:batch, :out_dim]


def init_params(key, input_dim, hidden_dim, output_dim, num_experts):
    ks = jax.random.split(key, 12)
    s = 0.05

    def w(k, shape):
        return (s * jax.random.normal(k, shape)).astype(jnp.float32)

    # gating: in -> 128 -> 256 -> 128 -> num_experts   (weights stored (in, out))
    gw1 = w(ks[0], (input_dim, 128));      gb1 = w(ks[1], (1, 128))
    gw2 = w(ks[2], (128, 256));            gb2 = w(ks[3], (1, 256))
    gw3 = w(ks[4], (256, 128));            gb3 = w(ks[5], (1, 128))
    gw4 = w(ks[6], (128, num_experts));    gb4 = w(ks[7], (1, num_experts))
    # experts (stacked over a leading expert axis)
    ew1 = w(ks[8], (num_experts, input_dim, hidden_dim))
    eb1 = w(ks[9], (num_experts, 1, hidden_dim))
    ew2 = w(ks[10], (num_experts, hidden_dim, output_dim))
    eb2 = w(ks[11], (num_experts, 1, output_dim))
    return (gw1, gb1, gw2, gb2, gw3, gb3, gw4, gb4, ew1, eb1, ew2, eb2)


def moe_reference(x, params, matmul_dtype=None):
    """Pure-JAX reference mirroring the PyTorch forward (eval mode).

    If `matmul_dtype` is given, matmul operands are cast to it (f32 accumulate),
    mirroring the kernel's dtype policy for a tight apples-to-apples check.
    """
    (gw1, gb1, gw2, gb2, gw3, gb3, gw4, gb4, ew1, eb1, ew2, eb2) = params

    def mm(a, w):
        if matmul_dtype is not None:
            a = a.astype(matmul_dtype)
            w = w.astype(matmul_dtype)
        return jnp.dot(a, w, preferred_element_type=jnp.float32)

    h = jnp.maximum(mm(x, gw1) + gb1, 0.0)
    h = mm(h, gw2) + gb2
    h = jnp.where(h > 0, h, NEG_SLOPE * h)
    h = mm(h, gw3) + gb3
    h = jnp.where(h > 0, h, NEG_SLOPE * h)
    gates = jax.nn.softmax(mm(h, gw4) + gb4, axis=1)             # (B, E)
    outs = []
    for e in range(ew1.shape[0]):
        h1 = jnp.maximum(mm(x, ew1[e]) + eb1[e], 0.0)
        outs.append(jax.nn.softmax(mm(h1, ew2[e]) + eb2[e], axis=1))
    expert_outputs = jnp.stack(outs, axis=2)                     # (B, out, E)
    return jnp.sum(expert_outputs * gates[:, None, :], axis=2)


if __name__ == "__main__":
    B, input_dim, hidden_dim, output_dim, num_experts = 8, 32, 32, 16, 4

    key = jax.random.PRNGKey(0)
    kx, kp = jax.random.split(key)
    x = jax.random.normal(kx, (B, input_dim), dtype=jnp.float32)
    params = init_params(kp, input_dim, hidden_dim, output_dim, num_experts)

    packed, meta = pack_params(params)
    out = jax.block_until_ready(moe_forward(x, packed, meta))
    assert out.shape == (B, output_dim)

    # Tight check vs. a reference that uses the same bf16-matmul / f32-accum
    # dtype policy as the kernel.
    ref_bf16 = moe_reference(x, params, matmul_dtype=jnp.bfloat16)
    assert jnp.allclose(out, ref_bf16, rtol=1e-3, atol=1e-3), \
        "mismatch vs bf16-matched reference"

    # Loose sanity check vs. the pure-f32 reference (allows bf16 quantization).
    ref_f32 = moe_reference(x, params)
    assert jnp.allclose(out, ref_f32, rtol=2e-2, atol=5e-3), \
        "mismatch vs f32 reference"

    print("KERNEL_OK")
</pallas_src>

<mosaic_0001>
module attributes {stable_mosaic.version = 11 : i64} {
  func.func @moe_kernel(%arg0: i32, %arg1: memref<16x32xbf16, #tpu.memory_space<vmem>>, %arg2: memref<32x256xbf16, #tpu.memory_space<vmem>>, %arg3: memref<1x256xf32, #tpu.memory_space<vmem>>, %arg4: memref<128x256xbf16, #tpu.memory_space<vmem>>, %arg5: memref<1x256xf32, #tpu.memory_space<vmem>>, %arg6: memref<256x128xbf16, #tpu.memory_space<vmem>>, %arg7: memref<1x128xf32, #tpu.memory_space<vmem>>, %arg8: memref<128x4xbf16, #tpu.memory_space<vmem>>, %arg9: memref<1x4xf32, #tpu.memory_space<vmem>>, %arg10: memref<128x64xbf16, #tpu.memory_space<vmem>>, %arg11: memref<1x64xf32, #tpu.memory_space<vmem>>, %arg12: memref<64x4xbf16, #tpu.memory_space<vmem>>, %arg13: memref<4x64xbf16, #tpu.memory_space<vmem>>, %arg14: memref<64x128xbf16, #tpu.memory_space<vmem>>, %arg15: memref<16x128xf32, #tpu.memory_space<vmem>>) attributes {dimension_semantics = [#tpu.dimension_semantics<parallel>], iteration_bounds = array<i64: 1>, scalar_prefetch = 0 : i64, scratch_operands = 0 : i64, tpu.core_type = #tpu.core_type<tc>, window_params = [{transform_indices = @transform_0, window_bounds = array<i64: 16, 32>}, {pipeline_mode = #tpu.pipeline_mode<synchronous>, transform_indices = @transform_1, window_bounds = array<i64: 32, 256>}, {pipeline_mode = #tpu.pipeline_mode<synchronous>, transform_indices = @transform_2, window_bounds = array<i64: 1, 256>}, {pipeline_mode = #tpu.pipeline_mode<synchronous>, transform_indices = @transform_3, window_bounds = array<i64: 128, 256>}, {pipeline_mode = #tpu.pipeline_mode<synchronous>, transform_indices = @transform_4, window_bounds = array<i64: 1, 256>}, {pipeline_mode = #tpu.pipeline_mode<synchronous>, transform_indices = @transform_5, window_bounds = array<i64: 256, 128>}, {pipeline_mode = #tpu.pipeline_mode<synchronous>, transform_indices = @transform_6, window_bounds = array<i64: 1, 128>}, {pipeline_mode = #tpu.pipeline_mode<synchronous>, transform_indices = @transform_7, window_bounds = array<i64: 128, 4>}, {pipeline_mode = #tpu.pipeline_mode<synchronous>, transform_indices = @transform_8, window_bounds = array<i64: 1, 4>}, {pipeline_mode = #tpu.pipeline_mode<synchronous>, transform_indices = @transform_9, window_bounds = array<i64: 128, 64>}, {pipeline_mode = #tpu.pipeline_mode<synchronous>, transform_indices = @transform_10, window_bounds = array<i64: 1, 64>}, {pipeline_mode = #tpu.pipeline_mode<synchronous>, transform_indices = @transform_11, window_bounds = array<i64: 64, 4>}, {pipeline_mode = #tpu.pipeline_mode<synchronous>, transform_indices = @transform_12, window_bounds = array<i64: 4, 64>}, {pipeline_mode = #tpu.pipeline_mode<synchronous>, transform_indices = @transform_13, window_bounds = array<i64: 64, 128>}, {transform_indices = @transform_14, window_bounds = array<i64: 16, 128>}]} {
    %c0 = arith.constant 0 : index
    %c0_0 = arith.constant 0 : index
    %0 = vector.load %arg1[%c0, %c0_0] : memref<16x32xbf16, #tpu.memory_space<vmem>>, vector<16x32xbf16>
    %c0_1 = arith.constant 0 : index
    %c0_2 = arith.constant 0 : index
    %1 = vector.load %arg2[%c0_1, %c0_2] : memref<32x256xbf16, #tpu.memory_space<vmem>>, vector<32x256xbf16>
    %cst = arith.constant dense<0.000000e+00> : vector<16x256xf32>
    %2 = tpu.matmul %0, %1, %cst {dimension_numbers = #tpu.dot_dimension_numbers<[1], [0], [0], [1], [0, 0, 1, 1], [], []>} : vector<16x32xbf16>, vector<32x256xbf16>, vector<16x256xf32> -> vector<16x256xf32>
    %c0_3 = arith.constant 0 : index
    %c0_4 = arith.constant 0 : index
    %3 = vector.load %arg3[%c0_3, %c0_4] : memref<1x256xf32, #tpu.memory_space<vmem>>, vector<1x256xf32>
    %4 = vector.broadcast %3 : vector<1x256xf32> to vector<16x256xf32>
    %5 = arith.addf %2, %4 : vector<16x256xf32>
    %cst_5 = arith.constant 0.000000e+00 : f32
    %6 = vector.broadcast %cst_5 : f32 to vector<16x256xf32>
    %7 = arith.maximumf %5, %6 : vector<16x256xf32>
    %8 = vector.extract_strided_slice %7 {offsets = [0, 0], sizes = [16, 128], strides = [1, 1]} : vector<16x256xf32> to vector<16x128xf32>
    %9 = vector.extract_strided_slice %7 {offsets = [0, 128], sizes = [16, 128], strides = [1, 1]} : vector<16x256xf32> to vector<16x128xf32>
    %10 = arith.truncf %8 : vector<16x128xf32> to vector<16x128xbf16>
    %c0_6 = arith.constant 0 : index
    %c0_7 = arith.constant 0 : index
    %11 = vector.load %arg4[%c0_6, %c0_7] : memref<128x256xbf16, #tpu.memory_space<vmem>>, vector<128x256xbf16>
    %cst_8 = arith.constant dense<0.000000e+00> : vector<16x256xf32>
    %12 = tpu.matmul %10, %11, %cst_8 {dimension_numbers = #tpu.dot_dimension_numbers<[1], [0], [0], [1], [0, 0, 1, 1], [], []>} : vector<16x128xbf16>, vector<128x256xbf16>, vector<16x256xf32> -> vector<16x256xf32>
    %c0_9 = arith.constant 0 : index
    %c0_10 = arith.constant 0 : index
    %13 = vector.load %arg5[%c0_9, %c0_10] : memref<1x256xf32, #tpu.memory_space<vmem>>, vector<1x256xf32>
    %14 = vector.broadcast %13 : vector<1x256xf32> to vector<16x256xf32>
    %15 = arith.addf %12, %14 : vector<16x256xf32>
    %cst_11 = arith.constant 0.000000e+00 : f32
    %16 = vector.broadcast %cst_11 : f32 to vector<16x256xf32>
    %17 = arith.cmpf ogt, %15, %16 : vector<16x256xf32>
    %cst_12 = arith.constant 0.00999999977 : f32
    %18 = vector.broadcast %cst_12 : f32 to vector<16x256xf32>
    %19 = arith.mulf %18, %15 : vector<16x256xf32>
    %20 = arith.select %17, %15, %19 : vector<16x256xi1>, vector<16x256xf32>
    %21 = arith.truncf %20 : vector<16x256xf32> to vector<16x256xbf16>
    %c0_13 = arith.constant 0 : index
    %c0_14 = arith.constant 0 : index
    %22 = vector.load %arg6[%c0_13, %c0_14] : memref<256x128xbf16, #tpu.memory_space<vmem>>, vector<256x128xbf16>
    %cst_15 = arith.constant dense<0.000000e+00> : vector<16x128xf32>
    %23 = tpu.matmul %21, %22, %cst_15 {dimension_numbers = #tpu.dot_dimension_numbers<[1], [0], [0], [1], [0, 0, 1, 1], [], []>} : vector<16x256xbf16>, vector<256x128xbf16>, vector<16x128xf32> -> vector<16x128xf32>
    %c0_16 = arith.constant 0 : index
    %c0_17 = arith.constant 0 : index
    %24 = vector.load %arg7[%c0_16, %c0_17] : memref<1x128xf32, #tpu.memory_space<vmem>>, vector<1x128xf32>
    %25 = vector.broadcast %24 : vector<1x128xf32> to vector<16x128xf32>
    %26 = arith.addf %23, %25 : vector<16x128xf32>
    %cst_18 = arith.constant 0.000000e+00 : f32
    %27 = vector.broadcast %cst_18 : f32 to vector<16x128xf32>
    %28 = arith.cmpf ogt, %26, %27 : vector<16x128xf32>
    %cst_19 = arith.constant 0.00999999977 : f32
    %29 = vector.broadcast %cst_19 : f32 to vector<16x128xf32>
    %30 = arith.mulf %29, %26 : vector<16x128xf32>
    %31 = arith.select %28, %26, %30 : vector<16x128xi1>, vector<16x128xf32>
    %32 = arith.truncf %31 : vector<16x128xf32> to vector<16x128xbf16>
    %c0_20 = arith.constant 0 : index
    %c0_21 = arith.constant 0 : index
    %33 = vector.load %arg8[%c0_20, %c0_21] : memref<128x4xbf16, #tpu.memory_space<vmem>>, vector<128x4xbf16>
    %cst_22 = arith.constant dense<0.000000e+00> : vector<16x4xf32>
    %34 = tpu.matmul %32, %33, %cst_22 {dimension_numbers = #tpu.dot_dimension_numbers<[1], [0], [0], [1], [0, 0, 1, 1], [], []>} : vector<16x128xbf16>, vector<128x4xbf16>, vector<16x4xf32> -> vector<16x4xf32>
    %c0_23 = arith.constant 0 : index
    %c0_24 = arith.constant 0 : index
    %35 = vector.load %arg9[%c0_23, %c0_24] : memref<1x4xf32, #tpu.memory_space<vmem>>, vector<1x4xf32>
    %36 = vector.broadcast %35 : vector<1x4xf32> to vector<16x4xf32>
    %37 = arith.addf %34, %36 : vector<16x4xf32>
    %cst_25 = arith.constant dense<0xFF800000> : vector<16xf32>
    %38 = vector.multi_reduction <maximumf>, %37, %cst_25 [1] : vector<16x4xf32> to vector<16xf32>
    %39 = vector.shape_cast %38 : vector<16xf32> to vector<16x1xf32>
    %40 = vector.broadcast %39 : vector<16x1xf32> to vector<16x4xf32>
    %41 = arith.subf %37, %40 : vector<16x4xf32>
    %42 = math.exp %41 : vector<16x4xf32>
    %cst_26 = arith.constant dense<0.000000e+00> : vector<16xf32>
    %43 = vector.multi_reduction <add>, %42, %cst_26 [1] : vector<16x4xf32> to vector<16xf32>
    %44 = vector.shape_cast %43 : vector<16xf32> to vector<16x1xf32>
    %45 = tpu.reciprocal %44 {approx = true} : vector<16x1xf32> -> vector<16x1xf32>
    %46 = vector.broadcast %45 : vector<16x1xf32> to vector<16x4xf32>
    %47 = arith.mulf %42, %46 : vector<16x4xf32>
    %48 = arith.truncf %9 : vector<16x128xf32> to vector<16x128xbf16>
    %c0_27 = arith.constant 0 : index
    %c0_28 = arith.constant 0 : index
    %49 = vector.load %arg10[%c0_27, %c0_28] : memref<128x64xbf16, #tpu.memory_space<vmem>>, vector<128x64xbf16>
    %cst_29 = arith.constant dense<0.000000e+00> : vector<16x64xf32>
    %50 = tpu.matmul %48, %49, %cst_29 {dimension_numbers = #tpu.dot_dimension_numbers<[1], [0], [0], [1], [0, 0, 1, 1], [], []>} : vector<16x128xbf16>, vector<128x64xbf16>, vector<16x64xf32> -> vector<16x64xf32>
    %c0_30 = arith.constant 0 : index
    %c0_31 = arith.constant 0 : index
    %51 = vector.load %arg11[%c0_30, %c0_31] : memref<1x64xf32, #tpu.memory_space<vmem>>, vector<1x64xf32>
    %52 = vector.broadcast %51 : vector<1x64xf32> to vector<16x64xf32>
    %53 = arith.addf %50, %52 : vector<16x64xf32>
    %c0_32 = arith.constant 0 : index
    %c0_33 = arith.constant 0 : index
    %54 = vector.load %arg13[%c0_32, %c0_33] : memref<4x64xbf16, #tpu.memory_space<vmem>>, vector<4x64xbf16>
    %55 = arith.extf %54 : vector<4x64xbf16> to vector<4x64xf32>
    %cst_34 = arith.constant 0.000000e+00 : f32
    %56 = vector.broadcast %cst_34 : f32 to vector<16x64xf32>
    %57 = vector.extract_strided_slice %55 {offsets = [0, 0], sizes = [1, 64], strides = [1, 1]} : vector<4x64xf32> to vector<1x64xf32>
    %cst_35 = arith.constant 0.000000e+00 : f32
    %58 = vector.broadcast %cst_35 : f32 to vector<1x64xf32>
    %59 = arith.cmpf ogt, %57, %58 : vector<1x64xf32>
    %cst_36 = arith.constant 0xFF800000 : f32
    %60 = vector.shape_cast %59 : vector<1x64xi1> to vector<1x64xi1>
    %61 = vector.broadcast %60 : vector<1x64xi1> to vector<16x64xi1>
    %62 = vector.broadcast %cst_36 : f32 to vector<16x64xf32>
    %63 = arith.select %61, %53, %62 : vector<16x64xi1>, vector<16x64xf32>
    %cst_37 = arith.constant dense<0xFF800000> : vector<16xf32>
    %64 = vector.multi_reduction <maximumf>, %63, %cst_37 [1] : vector<16x64xf32> to vector<16xf32>
    %65 = vector.shape_cast %64 : vector<16xf32> to vector<16x1xf32>
    %66 = vector.broadcast %65 : vector<16x1xf32> to vector<16x64xf32>
    %67 = vector.broadcast %57 : vector<1x64xf32> to vector<16x64xf32>
    %68 = arith.mulf %66, %67 : vector<16x64xf32>
    %69 = arith.addf %56, %68 : vector<16x64xf32>
    %70 = vector.extract_strided_slice %55 {offsets = [1, 0], sizes = [1, 64], strides = [1, 1]} : vector<4x64xf32> to vector<1x64xf32>
    %cst_38 = arith.constant 0.000000e+00 : f32
    %71 = vector.broadcast %cst_38 : f32 to vector<1x64xf32>
    %72 = arith.cmpf ogt, %70, %71 : vector<1x64xf32>
    %cst_39 = arith.constant 0xFF800000 : f32
    %73 = vector.shape_cast %72 : vector<1x64xi1> to vector<1x64xi1>
    %74 = vector.broadcast %73 : vector<1x64xi1> to vector<16x64xi1>
    %75 = vector.broadcast %cst_39 : f32 to vector<16x64xf32>
    %76 = arith.select %74, %53, %75 : vector<16x64xi1>, vector<16x64xf32>
    %cst_40 = arith.constant dense<0xFF800000> : vector<16xf32>
    %77 = vector.multi_reduction <maximumf>, %76, %cst_40 [1] : vector<16x64xf32> to vector<16xf32>
    %78 = vector.shape_cast %77 : vector<16xf32> to vector<16x1xf32>
    %79 = vector.broadcast %78 : vector<16x1xf32> to vector<16x64xf32>
    %80 = vector.broadcast %70 : vector<1x64xf32> to vector<16x64xf32>
    %81 = arith.mulf %79, %80 : vector<16x64xf32>
    %82 = arith.addf %69, %81 : vector<16x64xf32>
    %83 = vector.extract_strided_slice %55 {offsets = [2, 0], sizes = [1, 64], strides = [1, 1]} : vector<4x64xf32> to vector<1x64xf32>
    %cst_41 = arith.constant 0.000000e+00 : f32
    %84 = vector.broadcast %cst_41 : f32 to vector<1x64xf32>
    %85 = arith.cmpf ogt, %83, %84 : vector<1x64xf32>
    %cst_42 = arith.constant 0xFF800000 : f32
    %86 = vector.shape_cast %85 : vector<1x64xi1> to vector<1x64xi1>
    %87 = vector.broadcast %86 : vector<1x64xi1> to vector<16x64xi1>
    %88 = vector.broadcast %cst_42 : f32 to vector<16x64xf32>
    %89 = arith.select %87, %53, %88 : vector<16x64xi1>, vector<16x64xf32>
    %cst_43 = arith.constant dense<0xFF800000> : vector<16xf32>
    %90 = vector.multi_reduction <maximumf>, %89, %cst_43 [1] : vector<16x64xf32> to vector<16xf32>
    %91 = vector.shape_cast %90 : vector<16xf32> to vector<16x1xf32>
    %92 = vector.broadcast %91 : vector<16x1xf32> to vector<16x64xf32>
    %93 = vector.broadcast %83 : vector<1x64xf32> to vector<16x64xf32>
    %94 = arith.mulf %92, %93 : vector<16x64xf32>
    %95 = arith.addf %82, %94 : vector<16x64xf32>
    %96 = vector.extract_strided_slice %55 {offsets = [3, 0], sizes = [1, 64], strides = [1, 1]} : vector<4x64xf32> to vector<1x64xf32>
    %cst_44 = arith.constant 0.000000e+00 : f32
    %97 = vector.broadcast %cst_44 : f32 to vector<1x64xf32>
    %98 = arith.cmpf ogt, %96, %97 : vector<1x64xf32>
    %cst_45 = arith.constant 0xFF800000 : f32
    %99 = vector.shape_cast %98 : vector<1x64xi1> to vector<1x64xi1>
    %100 = vector.broadcast %99 : vector<1x64xi1> to vector<16x64xi1>
    %101 = vector.broadcast %cst_45 : f32 to vector<16x64xf32>
    %102 = arith.select %100, %53, %101 : vector<16x64xi1>, vector<16x64xf32>
    %cst_46 = arith.constant dense<0xFF800000> : vector<16xf32>
    %103 = vector.multi_reduction <maximumf>, %102, %cst_46 [1] : vector<16x64xf32> to vector<16xf32>
    %104 = vector.shape_cast %103 : vector<16xf32> to vector<16x1xf32>
    %105 = vector.broadcast %104 : vector<16x1xf32> to vector<16x64xf32>
    %106 = vector.broadcast %96 : vector<1x64xf32> to vector<16x64xf32>
    %107 = arith.mulf %105, %106 : vector<16x64xf32>
    %108 = arith.addf %95, %107 : vector<16x64xf32>
    %109 = arith.subf %53, %108 : vector<16x64xf32>
    %110 = math.exp %109 : vector<16x64xf32>
    %111 = arith.truncf %110 : vector<16x64xf32> to vector<16x64xbf16>
    %c0_47 = arith.constant 0 : index
    %c0_48 = arith.constant 0 : index
    %112 = vector.load %arg12[%c0_47, %c0_48] : memref<64x4xbf16, #tpu.memory_space<vmem>>, vector<64x4xbf16>
    %cst_49 = arith.constant dense<0.000000e+00> : vector<16x4xf32>
    %113 = tpu.matmul %111, %112, %cst_49 {dimension_numbers = #tpu.dot_dimension_numbers<[1], [0], [0], [1], [0, 0, 1, 1], [], []>} : vector<16x64xbf16>, vector<64x4xbf16>, vector<16x4xf32> -> vector<16x4xf32>
    %114 = tpu.reciprocal %113 {approx = true} : vector<16x4xf32> -> vector<16x4xf32>
    %115 = arith.mulf %47, %114 : vector<16x4xf32>
    %116 = arith.truncf %115 : vector<16x4xf32> to vector<16x4xbf16>
    %c0_50 = arith.constant 0 : index
    %c0_51 = arith.constant 0 : index
    %117 = vector.load %arg13[%c0_50, %c0_51] : memref<4x64xbf16, #tpu.memory_space<vmem>>, vector<4x64xbf16>
    %cst_52 = arith.constant dense<0.000000e+00> : vector<16x64xf32>
    %118 = tpu.matmul %116, %117, %cst_52 {dimension_numbers = #tpu.dot_dimension_numbers<[1], [0], [0], [1], [0, 0, 1, 1], [], []>} : vector<16x4xbf16>, vector<4x64xbf16>, vector<16x64xf32> -> vector<16x64xf32>
    %119 = arith.mulf %110, %118 : vector<16x64xf32>
    %120 = arith.truncf %119 : vector<16x64xf32> to vector<16x64xbf16>
    %c0_53 = arith.constant 0 : index
    %c0_54 = arith.constant 0 : index
    %121 = vector.load %arg14[%c0_53, %c0_54] : memref<64x128xbf16, #tpu.memory_space<vmem>>, vector<64x128xbf16>
    %cst_55 = arith.constant dense<0.000000e+00> : vector<16x128xf32>
    %122 = tpu.matmul %120, %121, %cst_55 {dimension_numbers = #tpu.dot_dimension_numbers<[1], [0], [0], [1], [0, 0, 1, 1], [], []>} : vector<16x64xbf16>, vector<64x128xbf16>, vector<16x128xf32> -> vector<16x128xf32>
    %c0_56 = arith.constant 0 : index
    %c0_57 = arith.constant 0 : index
    %123 = vector.load %arg15[%c0_56, %c0_57] : memref<16x128xf32, #tpu.memory_space<vmem>>, vector<16x128xf32>
    tpu.vector_store %arg15[%c0_56, %c0_57], %122 {strides = array<i32>} : memref<16x128xf32, #tpu.memory_space<vmem>>, vector<16x128xf32>,
    return
  }
  func.func @transform_0(%arg0: i32) -> (i32, i32) {
    %c0_i32 = arith.constant 0 : i32
    %c0_i32_0 = arith.constant 0 : i32
    return %arg0, %c0_i32 : i32, i32
  }
  func.func @transform_1(%arg0: i32) -> (i32, i32) {
    %c0_i32 = arith.constant 0 : i32
    %c0_i32_0 = arith.constant 0 : i32
    %c0_i32_1 = arith.constant 0 : i32
    return %c0_i32, %c0_i32_0 : i32, i32
  }
  func.func @transform_2(%arg0: i32) -> (i32, i32) {
    %c0_i32 = arith.constant 0 : i32
    %c0_i32_0 = arith.constant 0 : i32
    %c0_i32_1 = arith.constant 0 : i32
    return %c0_i32, %c0_i32_0 : i32, i32
  }
  func.func @transform_3(%arg0: i32) -> (i32, i32) {
    %c0_i32 = arith.constant 0 : i32
    %c0_i32_0 = arith.constant 0 : i32
    %c0_i32_1 = arith.constant 0 : i32
    return %c0_i32, %c0_i32_0 : i32, i32
  }
  func.func @transform_4(%arg0: i32) -> (i32, i32) {
    %c0_i32 = arith.constant 0 : i32
    %c0_i32_0 = arith.constant 0 : i32
    %c0_i32_1 = arith.constant 0 : i32
    return %c0_i32, %c0_i32_0 : i32, i32
  }
  func.func @transform_5(%arg0: i32) -> (i32, i32) {
    %c0_i32 = arith.constant 0 : i32
    %c0_i32_0 = arith.constant 0 : i32
    %c0_i32_1 = arith.constant 0 : i32
    return %c0_i32, %c0_i32_0 : i32, i32
  }
  func.func @transform_6(%arg0: i32) -> (i32, i32) {
    %c0_i32 = arith.constant 0 : i32
    %c0_i32_0 = arith.constant 0 : i32
    %c0_i32_1 = arith.constant 0 : i32
    return %c0_i32, %c0_i32_0 : i32, i32
  }
  func.func @transform_7(%arg0: i32) -> (i32, i32) {
    %c0_i32 = arith.constant 0 : i32
    %c0_i32_0 = arith.constant 0 : i32
    %c0_i32_1 = arith.constant 0 : i32
    return %c0_i32, %c0_i32_0 : i32, i32
  }
  func.func @transform_8(%arg0: i32) -> (i32, i32) {
    %c0_i32 = arith.constant 0 : i32
    %c0_i32_0 = arith.constant 0 : i32
    %c0_i32_1 = arith.constant 0 : i32
    return %c0_i32, %c0_i32_0 : i32, i32
  }
  func.func @transform_9(%arg0: i32) -> (i32, i32) {
    %c0_i32 = arith.constant 0 : i32
    %c0_i32_0 = arith.constant 0 : i32
    %c0_i32_1 = arith.constant 0 : i32
    return %c0_i32, %c0_i32_0 : i32, i32
  }
  func.func @transform_10(%arg0: i32) -> (i32, i32) {
    %c0_i32 = arith.constant 0 : i32
    %c0_i32_0 = arith.constant 0 : i32
    %c0_i32_1 = arith.constant 0 : i32
    return %c0_i32, %c0_i32_0 : i32, i32
  }
  func.func @transform_11(%arg0: i32) -> (i32, i32) {
    %c0_i32 = arith.constant 0 : i32
    %c0_i32_0 = arith.constant 0 : i32
    %c0_i32_1 = arith.constant 0 : i32
    return %c0_i32, %c0_i32_0 : i32, i32
  }
  func.func @transform_12(%arg0: i32) -> (i32, i32) {
    %c0_i32 = arith.constant 0 : i32
    %c0_i32_0 = arith.constant 0 : i32
    %c0_i32_1 = arith.constant 0 : i32
    return %c0_i32, %c0_i32_0 : i32, i32
  }
  func.func @transform_13(%arg0: i32) -> (i32, i32) {
    %c0_i32 = arith.constant 0 : i32
    %c0_i32_0 = arith.constant 0 : i32
    %c0_i32_1 = arith.constant 0 : i32
    return %c0_i32, %c0_i32_0 : i32, i32
  }
  func.func @transform_14(%arg0: i32) -> (i32, i32) {
    %c0_i32 = arith.constant 0 : i32
    %c0_i32_0 = arith.constant 0 : i32
    return %arg0, %c0_i32 : i32, i32
  }
}

</mosaic_0001>

<bundles_post_ra>
// kernel: tpu_custom_call.1
= control target key start
LH: loop header
LB: loop body
LE: loop exit
PB: predicated region body
PF: predicated region fallthrough
CT: control target
= control target key end

     0   :  { %19 = vsyncpa [#allocation3], 0  ;;  %s1908_s0 = inlined_call_operand.vmem [shape: bf16[16,32], index: 0, kind: input, shape index: {}]   ;;  %s1909_s1 = inlined_call_operand.vmem [shape: bf16[32,256], index: 1, kind: input, shape index: {}]   ;;  %s1910_s2 = inlined_call_operand.hbm [shape: f32[1,256], index: 2, kind: input, shape index: {}]   ;;  %s1911_s3 = inlined_call_operand.vmem [shape: bf16[128,256], index: 3, kind: input, shape index: {}]   ;;  %s1912_s4 = inlined_call_operand.hbm [shape: f32[1,256], index: 4, kind: input, shape index: {}]   ;;  %s1913_s5 = inlined_call_operand.hbm [shape: bf16[256,128], index: 5, kind: input, shape index: {}]   ;;  %s1914_s6 = inlined_call_operand.hbm [shape: f32[1,128], index: 6, kind: input, shape index: {}]   ;;  %s1915_s7 = inlined_call_operand.vmem [shape: bf16[128,4], index: 7, kind: input, shape index: {}]   ;;  %s1916_s8 = inlined_call_operand.vmem [shape: f32[1,4], index: 8, kind: input, shape index: {}]   ;;  %s1917_s9 = inlined_call_operand.vmem [shape: bf16[128,64], index: 9, kind: input, shape index: {}]   ;;  %s1918_s10 = inlined_call_operand.vmem [shape: f32[1,64], index: 10, kind: input, shape index: {}]   ;;  %s1919_s11 = inlined_call_operand.vmem [shape: bf16[64,4], index: 11, kind: input, shape index: {}]   ;;  %s1920_s12 = inlined_call_operand.vmem [shape: bf16[4,64], index: 12, kind: input, shape index: {}]   ;;  %s1921_s13 = inlined_call_operand.hbm [shape: bf16[64,128], index: 13, kind: input, shape index: {}]   ;;  %s1922_s14 = inlined_call_operand.hbm [shape: f32[16,128], index: 14, kind: output, shape index: {}]  }
   0x1   :  { %20 = vsyncpa [#allocation6], 0 }
   0x2   :  { %21 = vsyncpa [#allocation9], 0 }
   0x3   :  { %22 = vsyncpa [#allocation4], 0  ;;  %s1545_s29 = smov [#allocation5]   ;;  %s1546_s15 = smov [#allocation8]  }
   0x4   :  { %s45_s30 = sshll.u32 %s1545_s29, 4  ;;  %s67_s16 = sshll.u32 %s1546_s15, 4  ;;  %s46_s30 = int_to_ptr.vmem [resolvable:$true] %s45_s30  ;;  %s68_s16 = int_to_ptr.vmem [resolvable:$true] %s67_s16 }
   0x5   :  { %s1425_s17 = scalar_lea.vmem %s46_s30, 32  ;;  %p1430_p1 = scmp.lt.s32.totalorder %s46_s30, %s46_s30 }
   0x6   :  { %p1426_p0 = scmp.ne.s32.totalorder %s46_s30, %s1425_s17  ;;  %p1431_p2 = scmp.lt.s32.totalorder %s1425_s17, %s1425_s17 }
   0x8   :  { %p1432_p3 = por %p1431_p2, %p1430_p1 }
   0xa   :  { %p1433_p4 = pnand %p1432_p3, %p1426_p0 }
   0xc   :  { %1436 = shalt.err (!%p1433_p4)
}
   0xd   :  { %48 = dma.hbm_to_vmem [thread:$0]  %s1912_s4, 32, %s46_s30, [#allocation6]  }
   0xe   :  { %s1445_s20 = scalar_lea.vmem %s68_s16, 16  ;;  %s1449_s21 = scalar_lea.vmem %s68_s16, 32 }
   0xf   :  { %p1446_p5 = scmp.ne.s32.totalorder %s68_s16, %s1445_s20  ;;  %p1450_p6 = scmp.lt.s32.totalorder %s68_s16, %s68_s16 }
  0x10   :  { %p1451_p7 = scmp.lt.s32.totalorder %s1449_s21, %s1445_s20 }
  0x12   :  { %p1452_p8 = por %p1451_p7, %p1450_p6 }
  0x14   :  { %p1453_p9 = pnand %p1452_p8, %p1446_p5 }
  0x16   :  { %1456 = shalt.err (!%p1453_p9)
}
  0x17   :  { %70 = dma.hbm_to_vmem [thread:$0]  %s1914_s6, 16, %s68_s16, [#allocation9]  }
  0x18   :  { %s1547_s24 = smov [#allocation2]   ;;  %s1548_s26 = smov [#allocation7]  }
  0x19   :  { %s33_s25 = sshll.u32 %s1547_s24, 4  ;;  %s54_s27 = sshll.u32 %s1548_s26, 4  ;;  %s34_s25 = int_to_ptr.vmem [resolvable:$true] %s33_s25  ;;  %s55_s27 = int_to_ptr.vmem [resolvable:$true] %s54_s27 }
  0x1a   :  { %s1465_s28 = scalar_lea.vmem %s34_s25, 32  ;;  %p1470_p11 = scmp.lt.s32.totalorder %s34_s25, %s34_s25 }
  0x1b   :  { %p1466_p10 = scmp.ne.s32.totalorder %s34_s25, %s1465_s28  ;;  %p1471_p12 = scmp.lt.s32.totalorder %s1465_s28, %s1465_s28 }
  0x1d   :  { %p1472_p13 = por %p1471_p12, %p1470_p11 }
  0x1f   :  { %p1473_p0 = pnand %p1472_p13, %p1466_p10 }
  0x21   :  { %1476 = shalt.err (!%p1473_p0)
}
  0x22   :  { %36 = dma.hbm_to_vmem [thread:$0]  %s1910_s2, 32, %s34_s25, [#allocation3]  }
  0x23   :  { %s1485_s30 = scalar_lea.vmem %s55_s27, 2048  ;;  %p1490_p2 = scmp.lt.s32.totalorder %s55_s27, %s55_s27 }
  0x24   :  { %p1486_p1 = scmp.ne.s32.totalorder %s55_s27, %s1485_s30  ;;  %p1491_p3 = scmp.lt.s32.totalorder %s1485_s30, %s1485_s30 }
  0x26   :  { %p1492_p4 = por %p1491_p3, %p1490_p2 }
  0x28   :  { %p1493_p5 = pnand %p1492_p4, %p1486_p1 }
  0x2a   :  { %1496 = shalt.err (!%p1493_p5)
}
  0x2b   :  { %s1549_s6 = smov 64   ;;  %s1550_s15 = smov 4  }
  0x2c   :  { %60 = dma.hbm_to_vmem [thread:$0]  %s1913_s5, 2048, %s55_s27, [#allocation6], %s1549_s6, %s1549_s6, %s1550_s15  }
  0x2d   :  { %s1551_s18 = smov [#allocation10]  }
  0x2e   :  { %s88_s19 = sshll.u32 %s1551_s18, 4  ;;  %s89_s19 = int_to_ptr.vmem [resolvable:$true] %s88_s19 }
  0x2f   :  { %s1505_s20 = scalar_lea.vmem %s89_s19, 512  ;;  %p1510_p7 = scmp.lt.s32.totalorder %s89_s19, %s89_s19 }
  0x30   :  { %p1506_p6 = scmp.ne.s32.totalorder %s89_s19, %s1505_s20  ;;  %p1511_p8 = scmp.lt.s32.totalorder %s1505_s20, %s1505_s20 }
  0x32   :  { %p1512_p9 = por %p1511_p8, %p1510_p7 }
  0x34   :  { %p1513_p10 = pnand %p1512_p9, %p1506_p6 }
  0x36   :  { %1516 = shalt.err (!%p1513_p10)
}
  0x37   :  { %94 = dma.hbm_to_vmem [thread:$0]  %s1921_s13, 512, %s89_s19, [#allocation9], %s1549_s6, %s1549_s6, %s1550_s15  }
  0x38   :  { %1537 = dma.done.wait [#allocation3], 32  }
  0x39   :  { %1538 = vsyncadd [#allocation3], 4294967264 }
  0x3a   :  { %1539 = dma.done.wait [#allocation6], 2080  }
  0x3b   :  { %1540 = vsyncadd [#allocation6], 4294965216 }
  0x3c   :  { %1541 = dma.done.wait [#allocation9], 528  }
  0x3d   :  { %1542 = vsyncadd [#allocation9], 4294966768  ;;  %v1552_v0 = vmov 0   ;;  %v1330_v1 = vld [vmem:[%s1909_s1 + $0x14] ss:$8 sps:$4 sm:$0xff]   ;;  %v1336_v6 = vld [vmem:[%s1908_s0] sm:$0xff]   ;;  %v119_v32 = vlaneseq }
  0x3e   :  { %190 = vmatprep.mubr.bf16.mxu1 %v1552_v0  ;;  %v1332_v2 = vld [vmem:[%s1909_s1 + $0x10] ss:$8 sps:$4 sm:$0xff]   ;;  %170 = vmatprep.subr.bf16.mxu1 %v1330_v1  ;;  %v1333_v3 = vld [vmem:[%s1909_s1 + $0x4] ss:$8 sps:$4 sm:$0xff]   ;;  %v1335_v4 = vld [vmem:[%s1909_s1] ss:$8 sps:$4 sm:$0xff]  }
  0x3f   :  { %171 = vmatpush1.bf16.msra.mxu1 %v1332_v2  ;;  %v1339_v5 = vld [vmem:[%s1911_s3 + $0x74] ss:$8 sps:$4 sm:$0xff]   ;;  %vm154_vm0 = vcmask 261120   ;;  %v1337_v7 = vld [vmem:[%s1911_s3 + $0x70] ss:$8 sps:$4 sm:$0xff]   ;;  %v1367_v28 = vld [vmem:[#allocation7 + $0x60] sm:$0xff]  }
  0x40   :  { %172 = vmatprep.subr.bf16.mxu1 %v1333_v3  ;;  %v1342_v8 = vld [vmem:[%s1911_s3 + $0x64] ss:$8 sps:$4 sm:$0xff]   ;;  %v1340_v9 = vld [vmem:[%s1911_s3 + $0x60] ss:$8 sps:$4 sm:$0xff]   ;;  %v1345_v10 = vld [vmem:[%s1911_s3 + $0x54] ss:$8 sps:$4 sm:$0xff]  }
  0x41   :  { %v1343_v11 = vld [vmem:[%s1911_s3 + $0x50] ss:$8 sps:$4 sm:$0xff]   ;;  %v1348_v12 = vld [vmem:[%s1911_s3 + $0x44] ss:$8 sps:$4 sm:$0xff]   ;;  %v1346_v13 = vld [vmem:[%s1911_s3 + $0x40] ss:$8 sps:$4 sm:$0xff]  }
  0x42   :  { %v1351_v14 = vld [vmem:[%s1911_s3 + $0x34] ss:$8 sps:$4 sm:$0xff]   ;;  %v1349_v15 = vld [vmem:[%s1911_s3 + $0x30] ss:$8 sps:$4 sm:$0xff]   ;;  %v1354_v16 = vld [vmem:[%s1911_s3 + $0x24] ss:$8 sps:$4 sm:$0xff]  }
  0x43   :  { %173 = vmatpush1.bf16.msra.mxu1 %v1335_v4  ;;  %v1352_v17 = vld [vmem:[%s1911_s3 + $0x20] ss:$8 sps:$4 sm:$0xff]   ;;  %v1357_v18 = vld [vmem:[%s1911_s3 + $0x14] ss:$8 sps:$4 sm:$0xff]   ;;  %v1355_v19 = vld [vmem:[%s1911_s3 + $0x10] ss:$8 sps:$4 sm:$0xff]  }
  0x44   :  { %314 = vmatprep.subr.bf16.mxu1 %v1339_v5  ;;  %v1360_v20 = vld [vmem:[%s1911_s3 + $0x4] ss:$8 sps:$4 sm:$0xff]   ;;  %v1358_v21 = vld [vmem:[%s1911_s3] ss:$8 sps:$4 sm:$0xff]   ;;  %v1363_v24 = vld [vmem:[#allocation7 + $0x70] sm:$0xff]   ;;  %v1713_v33 = vshrl.u32 %v119_v32, 7 }
  0x45   :  { %v1361_v22 = vld [vmem:[#allocation7 + $0x78] sm:$0xff]   ;;  %v1364_v25 = vld [vmem:[#allocation7 + $0x30] sm:$0xff]   ;;  %v1365_v26 = vld [vmem:[#allocation7 + $0x68] sm:$0xff]   ;;  %v1553_v59 = vmov 0.0   ;;  %vm1554_vm1 = vmmov 0   ;;  %vm813_vm11 = vcmask 523264  }
  0x46   :  { %1132 = vmatmul.mubr.msk.bf16.vlgmr.msra.gmra.mxu1 %vm154_vm0, %v1336_v6  ;;  %v1362_v23 = vld [vmem:[#allocation7 + $0x38] sm:$0xff]   ;;  %1195 = vmatprep.subr.bf16.mxu0 %v1361_v22  ;;  %v1366_v27 = vld [vmem:[#allocation7 + $0x28] sm:$0xff]   ;;  %v1368_v29 = vld [vmem:[#allocation7 + $0x20] sm:$0xff]   ;;  %v1716_v34 = vsub.s32 0, %v1713_v33  ;;  %v1719_v35 = vsub.s32 1, %v1713_v33  ;;  %vm666_vm14 = vcmask 31744  }
  0x47   :  { %315 = vmatpush1.bf16.msra.mxu1 %v1337_v7  ;;  %346 = vmatprep.mubr.bf16.mxu1 %v1552_v0  ;;  %v1369_v30 = vld [vmem:[#allocation7 + $0x58] sm:$0xff]   ;;  %v1371_v53 = vld [vmem:[#allocation7 + $0x50] sm:$0xff]   ;;  %v1373_v55 = vld [vmem:[#allocation7 + $0x48] sm:$0xff]   ;;  %vm982_vm15 = vcmask 1041408  }
  0x48   :  { %316 = vmatprep.subr.bf16.mxu1 %v1342_v8  ;;  %1196 = vmatpush3.bf16.msra.mxu0 %v1362_v23  ;;  %v1370_v31 = vld [vmem:[#allocation7 + $0x18] sm:$0xff]   ;;  %v1372_v54 = vld [vmem:[#allocation7 + $0x10] sm:$0xff]   ;;  %v1374_v56 = vld [vmem:[#allocation7 + $0x8] sm:$0xff]  }
  0x49   :  { %1197 = vmatprep.subr.bf16.mxu0 %v1363_v24  ;;  %v117_v36 = vld [vmem:[#allocation2] sm:$0x3]  ;;  %v1375_v57 = vld [vmem:[#allocation7 + $0x40] sm:$0xff]   ;;  %v1385_v60 = vld [vmem:[%s1915_s7 + $0x38] sm:$0xff]  }
  0x4a   :  { %v122_v37 = vrot.slane %v117_v36, %v1716_v34  ;;  %v126_v38 = vrot.slane %v117_v36, %v1719_v35  ;;  %v1376_v58 = vld [vmem:[#allocation7] sm:$0xff]   ;;  %v1386_v61 = vld [vmem:[%s1915_s7 + $0x30] sm:$0xff]   ;;  %v222_v1 = vld [vmem:[#allocation5] sm:$0x3] }
  0x4b   :  { %317 = vmatpush1.bf16.msra.mxu1 %v1340_v9  ;;  %v1387_v62 = vld [vmem:[%s1915_s7 + $0x28] sm:$0xff]   ;;  %v1388_v63 = vld [vmem:[%s1915_s7 + $0x20] sm:$0xff]   ;;  %v231_v2 = vrot.slane %v222_v1, %v1719_v35  ;;  %v227_v3 = vrot.slane %v222_v1, %v1716_v34  ;;  %v1378_v23 = vld [vmem:[%s1917_s9 + $0x30] sm:$0xff]   ;;  %v872_v1 = vsub.s32 3, %v1713_v33 }
  0x4c   :  { %318 = vmatprep.subr.bf16.mxu1 %v1345_v10  ;;  %1198 = vmatpush3.bf16.msra.mxu0 %v1364_v25  ;;  %v1379_v24 = vld [vmem:[%s1917_s9 + $0x28] sm:$0xff]   ;;  %v1380_v25 = vld [vmem:[%s1917_s9 + $0x20] sm:$0xff]  }
  0x4d   :  { %1199 = vmatprep.subr.bf16.mxu0 %v1365_v26  ;;  %v1381_v26 = vld [vmem:[%s1917_s9 + $0x18] sm:$0xff]   ;;  %v1391_v32 = vld [vmem:[%s1915_s7 + $0x8] sm:$0xff]   ;;  %v1392_v36 = vld [vmem:[%s1915_s7] sm:$0xff]  }
  0x4f   :  { %319 = vmatpush1.bf16.msra.mxu1 %v1343_v11 }
  0x50   :  { %320 = vmatprep.subr.bf16.mxu1 %v1348_v12  ;;  %1200 = vmatpush3.bf16.msra.mxu0 %v1366_v27  ;;  %v1382_v27 = vld [vmem:[%s1917_s9 + $0x10] sm:$0xff]  }
  0x51   :  { %1201 = vmatprep.subr.bf16.mxu0 %v1367_v28  ;;  %v1383_v28 = vld [vmem:[%s1917_s9 + $0x8] sm:$0xff]  }
  0x53   :  { %321 = vmatpush1.bf16.msra.mxu1 %v1346_v13 }
  0x54   :  { %322 = vmatprep.subr.bf16.mxu1 %v1351_v14  ;;  %1202 = vmatpush3.bf16.msra.mxu0 %v1368_v29  ;;  %v1384_v29 = vld [vmem:[%s1917_s9] sm:$0xff]  }
  0x55   :  { %1203 = vmatprep.subr.bf16.mxu0 %v1369_v30  ;;  %v1389_v30 = vld [vmem:[%s1915_s7 + $0x18] sm:$0xff]  }
  0x57   :  { %323 = vmatpush1.bf16.msra.mxu1 %v1349_v15 }
  0x58   :  { %324 = vmatprep.subr.bf16.mxu1 %v1354_v16  ;;  %1204 = vmatpush3.bf16.msra.mxu0 %v1370_v31  ;;  %v1390_v31 = vld [vmem:[%s1915_s7 + $0x10] sm:$0xff]  }
  0x59   :  { %1205 = vmatprep.subr.bf16.mxu0 %v1371_v53 }
  0x5b   :  { %325 = vmatpush1.bf16.msra.mxu1 %v1352_v17 }
  0x5c   :  { %326 = vmatprep.subr.bf16.mxu1 %v1357_v18  ;;  %1206 = vmatpush3.bf16.msra.mxu0 %v1372_v54  ;;  %v851_v54 = vsub.s32 2, %v1713_v33 }
  0x5d   :  { %1207 = vmatprep.subr.bf16.mxu0 %v1373_v55 }
  0x5f   :  { %327 = vmatpush1.bf16.msra.mxu1 %v1355_v19 }
  0x60   :  { %328 = vmatprep.subr.bf16.mxu1 %v1360_v20  ;;  %1208 = vmatpush3.bf16.msra.mxu0 %v1374_v56 }
  0x61   :  { %1209 = vmatprep.subr.bf16.mxu0 %v1375_v57  ;;  %v1175_v57 = vld [vmem:[%s1918_s10] ss:$0 sm:$0xff] }
  0x63   :  { %329 = vmatpush1.bf16.msra.mxu1 %v1358_v21  ;;  %v1377_v21 = vld [vmem:[%s1917_s9 + $0x38] sm:$0xff]  }
  0x64   :  { %1210 = vmatpush3.bf16.msra.mxu0 %v1376_v58  ;;  %1247 = vmatprep.subr.bf16.mxu1 %v1553_v59 }
  0x65   :  { %1267 = vmatprep.subr.bf16.mxu0 %v1553_v59 }
 0x106   :  { %v192_v39 = vpop.f32.mrf.mxu1 }
 0x107   :  { %v193_v41 = vadd.f32 %v192_v39, %v122_v37 }
 0x108   :  { %v194_v40 = vpop.f32.mrf.mxu1 }
 0x109   :  { %v195_v42 = vadd.f32 %v194_v40, %v126_v38  ;;  %v201_v46 = vmax.f32 %v193_v41, 0.0 }
 0x10a   :  { %v196_v43 = vpop.f32.mrf.mxu1 }
 0x10b   :  { %v197_v44 = vadd.f32 %v196_v43, %v122_v37  ;;  %v202_v49 = vmax.f32 %v195_v42, 0.0 }
 0x10c   :  { %v198_v45 = vpop.f32.mrf.mxu1 }
 0x10d   :  { %v203_v47 = vmax.f32 %v197_v44, 0.0  ;;  %v199_v48 = vadd.f32 %v198_v45, %v126_v38  ;;  %v1149_v38 = vld [vmem:[#allocation8] ss:$0 sm:$0xff] }
 0x10f   :  { %v205_v50 = vpack.c.bf16 %v203_v47, %v201_v46  ;;  %v204_v51 = vmax.f32 %v199_v48, 0.0 }
 0x111   :  { %v1723_v52 = vpack.c.bf16 %v204_v51, %v202_v49  ;;  %347 = vmatmul.mubr.bf16.vlgmr.msra.gmra.mxu1 %v205_v50  ;;  %v1803_v51 = vld [vmem:[%s1920_s12] sm:$0x3] }
 0x112   :  { %1263 = vmatprep.mubr.msk.bf16.mxu1 %vm1554_vm1, %v1553_v59  ;;  %1248 = vmatpush3.bf16.msra.mxu1 %v1385_v60 }
 0x113   :  { %1249 = vmatprep.subr.bf16.mxu1 %v1553_v59 }
 0x116   :  { %1250 = vmatpush3.bf16.msra.mxu1 %v1386_v61 }
 0x117   :  { %1251 = vmatprep.subr.bf16.mxu1 %v1553_v59 }
 0x11a   :  { %1252 = vmatpush3.bf16.msra.mxu1 %v1387_v62 }
 0x11b   :  { %1253 = vmatprep.subr.bf16.mxu1 %v1553_v59 }
 0x11e   :  { %1254 = vmatpush3.bf16.msra.mxu1 %v1388_v63 }
 0x11f   :  { %1255 = vmatprep.subr.bf16.mxu1 %v1553_v59 }
 0x122   :  { %1256 = vmatpush3.bf16.msra.mxu1 %v1389_v30 }
 0x123   :  { %1257 = vmatprep.subr.bf16.mxu1 %v1553_v59 }
 0x126   :  { %1258 = vmatpush3.bf16.msra.mxu1 %v1390_v31 }
 0x127   :  { %1259 = vmatprep.subr.bf16.mxu1 %v1553_v59 }
 0x12a   :  { %1260 = vmatpush3.bf16.msra.mxu1 %v1391_v32 }
 0x12b   :  { %1261 = vmatprep.subr.bf16.mxu1 %v1553_v59 }
 0x12e   :  { %1262 = vmatpush3.bf16.msra.mxu1 %v1392_v36 }
 0x12f   :  { %1287 = vmatprep.subr.bf16.mxu1 %v1553_v59 }
 0x1d1   :  { %v348_v4 = vpop.f32.mrf.mxu1 }
 0x1d2   :  { %v349_v7 = vadd.f32 %v348_v4, %v227_v3 }
 0x1d3   :  { %v350_v5 = vpop.f32.mrf.mxu1 }
 0x1d4   :  { %v351_v6 = vadd.f32 %v350_v5, %v231_v2  ;;  %v361_v14 = vmul.f32 0.01, %v349_v7  ;;  %vm357_vm4 = vcmp.gt.f32.partialorder %v349_v7, 0.0 }
 0x1d5   :  { %v352_v8 = vpop.f32.mrf.mxu1 }
 0x1d6   :  { %v353_v9 = vadd.f32 %v352_v8, %v227_v3  ;;  %v362_v11 = vmul.f32 0.01, %v351_v6  ;;  %vm358_vm3 = vcmp.gt.f32.partialorder %v351_v6, 0.0  ;;  %v365_v20 = vsel %vm357_vm4, %v349_v7, %v361_v14 }
 0x1d7   :  { %v354_v10 = vpop.f32.mrf.mxu1 }
 0x1d8   :  { %vm359_vm2 = vcmp.gt.f32.partialorder %v353_v9, 0.0  ;;  %v363_v12 = vmul.f32 0.01, %v353_v9  ;;  %v355_v13 = vadd.f32 %v354_v10, %v231_v2  ;;  %v366_v17 = vsel %vm358_vm3, %v351_v6, %v362_v11 }
 0x1da   :  { %v364_v15 = vmul.f32 0.01, %v355_v13  ;;  %vm360_vm5 = vcmp.gt.f32.partialorder %v355_v13, 0.0  ;;  %v367_v16 = vsel %vm359_vm2, %v353_v9, %v363_v12 }
 0x1db   :  { %v369_v22 = vpack.c.bf16 %v367_v16, %v365_v20 }
 0x1dc   :  { %v368_v18 = vsel %vm360_vm5, %v355_v13, %v364_v15 }
 0x1dd   :  { %v370_v19 = vpack.c.bf16 %v368_v18, %v366_v17 }
 0x1df   :  { %538 = vmatprep.mubr.bf16.mxu0 %v370_v19 }
 0x1e0   :  { %539 = vmatmul.mubr.bf16.vlgmr.msra.gmra.mxu0 %v369_v22  ;;  %v1394_v22 = vld [vmem:[%s1919_s11 + $0x10] sm:$0xff]  }
 0x1e1   :  { %1268 = vmatpush3.bf16.msra.mxu0 %v1377_v21  ;;  %1283 = vmatprep.mubr.msk.bf16.mxu0 %vm1554_vm1, %v1553_v59  ;;  %v1393_v21 = vld [vmem:[%s1919_s11 + $0x18] sm:$0xff]  }
 0x1e2   :  { %1269 = vmatprep.subr.bf16.mxu0 %v1553_v59 }
 0x1e5   :  { %1270 = vmatpush3.bf16.msra.mxu0 %v1378_v23  ;;  %v1395_v23 = vld [vmem:[%s1919_s11 + $0x8] sm:$0xff]  }
 0x1e6   :  { %1271 = vmatprep.subr.bf16.mxu0 %v1553_v59 }
 0x1e9   :  { %1272 = vmatpush3.bf16.msra.mxu0 %v1379_v24  ;;  %v1396_v24 = vld [vmem:[%s1919_s11] sm:$0xff]  }
 0x1ea   :  { %1273 = vmatprep.subr.bf16.mxu0 %v1553_v59 }
 0x1ed   :  { %1274 = vmatpush3.bf16.msra.mxu0 %v1380_v25 }
 0x1ee   :  { %1275 = vmatprep.subr.bf16.mxu0 %v1553_v59 }
 0x1f1   :  { %1276 = vmatpush3.bf16.msra.mxu0 %v1381_v26 }
 0x1f2   :  { %1277 = vmatprep.subr.bf16.mxu0 %v1553_v59 }
 0x1f5   :  { %1278 = vmatpush3.bf16.msra.mxu0 %v1382_v27 }
 0x1f6   :  { %1279 = vmatprep.subr.bf16.mxu0 %v1553_v59 }
 0x1f9   :  { %1280 = vmatpush3.bf16.msra.mxu0 %v1383_v28 }
 0x1fa   :  { %1281 = vmatprep.subr.bf16.mxu0 %v1553_v59 }
 0x1fd   :  { %1282 = vmatpush3.bf16.msra.mxu0 %v1384_v29 }
 0x1fe   :  { %1299 = vmatprep.subr.bf16.mxu0 %v1553_v59 }
 0x200   :  { %1284 = vmatmul.mubr.bf16.vlgmr.msra.gmra.mxu0 %v1723_v52  ;;  %v1808_v52 = vunpack.c.l.bf16 %v1803_v51 }
 0x201   :  { %1301 = vmatprep.mubr.msk.bf16.mxu0 %vm1554_vm1, %v1553_v59 }
 0x202   :  { %vm804_vm8 = vcmp.gt.f32.partialorder %v1808_v52, 0.0  ;;  %v844_v27 = vrot.slane %v1808_v52, %v1719_v35  ;;  %v823_v28 = vrot.slane %v1808_v52, %v1716_v34  ;;  %v865_v31 = vrot.slane %v1808_v52, %v851_v54 }
 0x203   :  { %v805_v53 = vsel %vm804_vm8, 1, %v1552_v0 }
 0x204   :  { %v831_v55 = vrot.slane %v805_v53, %v1719_v35  ;;  %v809_v56 = vrot.slane %v805_v53, %v1716_v34  ;;  %v852_v58 = vrot.slane %v805_v53, %v851_v54  ;;  %v873_v9 = vrot.slane %v805_v53, %v872_v1 }
 0x206   :  { %vm1818_vm9 = vcmp.eq.s32.totalorder %v831_v55, 1  ;;  %vm1822_vm10 = vcmp.eq.s32.totalorder %v809_v56, 1  ;;  %vm853_vm12 = vcmp.eq.s32.totalorder %v852_v58, 1  ;;  %vm874_vm13 = vcmp.eq.s32.totalorder %v873_v9, 1 }
 0x2a0   :  { %v1211_v37 = vpop.f32.mrf.mxu0 }
 0x2a2   :  { %v1212_v39 = vpop.f32.mrf.mxu0 }
 0x2a3   :  { %v1213_v40 = vadd.f32 %v1212_v39, %v1211_v37 }
 0x2a4   :  { %v1214_v41 = vpop.f32.mrf.mxu0 }
 0x2a5   :  { %v541_v42 = vadd.f32 %v1213_v40, %v1149_v38 }
 0x2a6   :  { %v1215_v43 = vpop.f32.mrf.mxu0 }
 0x2a7   :  { %v1216_v44 = vadd.f32 %v1215_v43, %v1214_v41  ;;  %v549_v45 = vmul.f32 0.01, %v541_v42  ;;  %vm547_vm6 = vcmp.gt.f32.partialorder %v541_v42, 0.0 }
 0x2a9   :  { %v544_v46 = vadd.f32 %v1216_v44, %v1149_v38  ;;  %v551_v48 = vsel %vm547_vm6, %v541_v42, %v549_v45  ;;  %v886_v42 = vrot.slane %v1808_v52, %v872_v1  ;;  %v1166_v52 = vld [vmem:[%s1916_s8] ss:$0 sm:$0xff]  ;;  %s1555_s8 = smov [#allocation11]  }
 0x2aa   :  { %s1113_s6 = sshll.u32 %s1555_s8, 4  ;;  %s1114_s6 = int_to_ptr.vmem [resolvable:$true] %s1113_s6 }
 0x2ab   :  { %vm548_vm7 = vcmp.gt.f32.partialorder %v544_v46, 0.0  ;;  %v550_v47 = vmul.f32 0.01, %v544_v46  ;;  %s1517_s15 = scalar_lea.vmem %s1114_s6, 256  ;;  %p1522_p12 = scmp.lt.s32.totalorder %s1114_s6, %s1114_s6 }
 0x2ac   :  { %p1518_p11 = scmp.ne.s32.totalorder %s1114_s6, %s1517_s15  ;;  %p1523_p13 = scmp.lt.s32.totalorder %s1517_s15, %s1517_s15 }
 0x2ad   :  { %v552_v49 = vsel %vm548_vm7, %v544_v46, %v550_v47 }
 0x2ae   :  { %v553_v50 = vpack.c.bf16 %v552_v49, %v551_v48  ;;  %p1524_p0 = por %p1523_p13, %p1522_p12 }
 0x2b0   :  { %1264 = vmatmul.mubr.bf16.vlgmr.msra.gmra.mxu1 %v553_v50  ;;  %p1525_p1 = pnand %p1524_p0, %p1518_p11 }
 0x2b1   :  { %1295 = vmatprep.mubr.msk.bf16.mxu1 %vm1554_vm1, %v1553_v59  ;;  %1288 = vmatpush3.bf16.msra.mxu1 %v1393_v21 }
 0x2b2   :  { %1289 = vmatprep.subr.bf16.mxu1 %v1553_v59 }
 0x2b5   :  { %1290 = vmatpush3.bf16.msra.mxu1 %v1394_v22 }
 0x2b6   :  { %1291 = vmatprep.subr.bf16.mxu1 %v1553_v59 }
 0x2b9   :  { %1292 = vmatpush3.bf16.msra.mxu1 %v1395_v23 }
 0x2ba   :  { %1293 = vmatprep.subr.bf16.mxu1 %v1553_v59 }
 0x2bd   :  { %1294 = vmatpush3.bf16.msra.mxu1 %v1396_v24 }
 0x2c0   :  { %v795_v60 = vpop.f32.mrf.mxu0 }
 0x2c1   :  { %v1826_v0 = vadd.f32 %v1175_v57, %v795_v60 }
 0x2c2   :  { %v1285_v63 = vpop.f32.mrf.mxu0 }
 0x2c3   :  { %v833_v2 = vsel %vm1818_vm9, %v1826_v0, -inf  ;;  %v811_v3 = vsel %vm1822_vm10, %v1826_v0, -inf  ;;  %v854_v33 = vsel %vm853_vm12, %v1826_v0, -inf  ;;  %v875_v18 = vsel %vm874_vm13, %v1826_v0, -inf }
 0x2c4   :  { %v798_v4 = vpop.f32.mrf.mxu0  ;;  %v835_v5 = vsel %vm813_vm11, %v833_v2, -inf  ;;  %v814_v6 = vsel %vm813_vm11, %v811_v3, -inf  ;;  %v856_v11 = vsel %vm813_vm11, %v854_v33, -inf  ;;  %v877_v20 = vsel %vm813_vm11, %v875_v18, -inf }
 0x2c5   :  { %v1837_v7 = vadd.f32 %v1175_v57, %v798_v4  ;;  %836 = vmax.xlane.f32.xlu1 %v835_v5  ;;  %815 = vmax.xlane.f32.xlu0 %v814_v6 }
 0x2c6   :  { %v1286_v8 = vpop.f32.mrf.mxu0 }
 0x2c7   :  { %v834_v10 = vsel %vm1818_vm9, %v1837_v7, -inf  ;;  %v855_v13 = vsel %vm853_vm12, %v1837_v7, -inf  ;;  %v812_v14 = vsel %vm1822_vm10, %v1837_v7, -inf  ;;  %v876_v17 = vsel %vm874_vm13, %v1837_v7, -inf }
 0x2c8   :  { %v838_v12 = vsel %vm813_vm11, %v834_v10, -inf  ;;  %v859_v15 = vsel %vm813_vm11, %v855_v13, -inf  ;;  %v817_v16 = vsel %vm813_vm11, %v812_v14, -inf  ;;  %v880_v19 = vsel %vm813_vm11, %v876_v17, -inf }
 0x2c9   :  { %857 = vmax.xlane.f32.xlu0 %v856_v11  ;;  %839 = vmax.xlane.f32.xlu1 %v838_v12 }
 0x2cd   :  { %860 = vmax.xlane.f32.xlu1 %v859_v15  ;;  %818 = vmax.xlane.f32.xlu0 %v817_v16  ;;  %v984_v15 = vsel %vm982_vm15, %v1803_v51, 0 }
 0x2ce   :  { %1300 = vmatpush3.bf16.msra.mxu0 %v984_v15 }
 0x2cf   :  { %1305 = vmatprep.subr.bf16.mxu0 %v1553_v59 }
 0x2d1   :  { %881 = vmax.xlane.f32.xlu1 %v880_v19  ;;  %878 = vmax.xlane.f32.xlu0 %v877_v20 }
 0x34e   :  { %v837_v25 = vpop.xlane.xlu1 %836  ;;  %v816_v26 = vpop.xlane.xlu0 %815 }
 0x34f   :  { %v845_v32 = vmul.f32 %v844_v27, %v837_v25  ;;  %v824_v36 = vmul.f32 %v823_v28, %v816_v26 }
 0x351   :  { %v847_v43 = vadd.f32 %v845_v32, %v824_v36  ;;  %v1399_v32 = vld [vmem:[#allocation10 + $0x8] sm:$0xff]   ;;  %v1400_v36 = vld [vmem:[#allocation10] sm:$0xff]  }
 0x352   :  { %v858_v29 = vpop.xlane.xlu0 %857  ;;  %v840_v30 = vpop.xlane.xlu1 %839 }
 0x353   :  { %v866_v39 = vmul.f32 %v865_v31, %v858_v29  ;;  %v846_v40 = vmul.f32 %v844_v27, %v840_v30  ;;  %v1397_v29 = vld [vmem:[#allocation10 + $0x18] sm:$0xff]  }
 0x355   :  { %v868_v47 = vadd.f32 %v866_v39, %v847_v43 }
 0x356   :  { %v861_v37 = vpop.xlane.xlu1 %860  ;;  %v819_v38 = vpop.xlane.xlu0 %818 }
 0x357   :  { %v825_v41 = vmul.f32 %v823_v28, %v819_v38  ;;  %v867_v44 = vmul.f32 %v865_v31, %v861_v37  ;;  %v1398_v31 = vld [vmem:[#allocation10 + $0x10] sm:$0xff]  }
 0x359   :  { %v848_v45 = vadd.f32 %v846_v40, %v825_v41 }
 0x35a   :  { %v882_v35 = vpop.xlane.xlu1 %881  ;;  %v879_v46 = vpop.xlane.xlu0 %878 }
 0x35b   :  { %v869_v34 = vadd.f32 %v867_v44, %v848_v45  ;;  %v888_v48 = vmul.f32 %v886_v42, %v882_v35  ;;  %v887_v49 = vmul.f32 %v886_v42, %v879_v46 }
 0x35d   :  { %v890_v50 = vadd.f32 %v888_v48, %v869_v34  ;;  %v889_v53 = vadd.f32 %v887_v49, %v868_v47 }
 0x35f   :  { %v892_v54 = vsub.f32 %v1837_v7, %v890_v50  ;;  %v891_v55 = vsub.f32 %v1826_v0, %v889_v53 }
 0x361   :  { %v895_v56 = vmul.f32 1.442695, %v892_v54  ;;  %v893_v57 = vmul.f32 1.442695, %v891_v55 }
 0x363   :  { %1401 = vpow2.f32 %v895_v56 }
 0x364   :  { %1403 = vpow2.f32 %v893_v57 }
 0x370   :  { %v1883_v58 = vpop.eup %1401  ;;  %v659_v60 = vpop.f32.mrf.mxu1 }
 0x371   :  { %v1885_v61 = vpop.eup %1403  ;;  %v660_v62 = vadd.f32 %v1166_v52, %v659_v60 }
 0x372   :  { %v1265_v63 = vpop.f32.mrf.mxu1  ;;  %v897_v1 = vpack.c.bf16 %v1883_v58, %v1885_v61 }
 0x373   :  { %v667_v0 = vsel %vm666_vm14, %v660_v62, -inf }
 0x374   :  { %1296 = vmatmul.mubr.msk.bf16.vlgmr.msra.gmra.mxu1 %vm813_vm11, %v897_v1  ;;  %668 = vmax.xlane.f32.xlu0 %v667_v0  ;;  %v662_v2 = vpop.f32.mrf.mxu1 }
 0x375   :  { %v663_v3 = vadd.f32 %v1166_v52, %v662_v2 }
 0x376   :  { %v1266_v4 = vpop.f32.mrf.mxu1 }
 0x377   :  { %v670_v5 = vsel %vm666_vm14, %v663_v3, -inf }
 0x378   :  { %671 = vmax.xlane.f32.xlu1 %v670_v5 }
 0x3fd   :  { %v669_v6 = vpop.xlane.xlu0 %668 }
 0x3fe   :  { %v673_v7 = vsub.f32 %v660_v62, %v669_v6 }
 0x400   :  { %v675_v33 = vmul.f32 1.442695, %v673_v7 }
 0x401   :  { %v672_v8 = vpop.xlane.xlu1 %671 }
 0x402   :  { %1405 = vpow2.f32 %v675_v33  ;;  %v674_v9 = vsub.f32 %v663_v3, %v672_v8 }
 0x404   :  { %v677_v10 = vmul.f32 1.442695, %v674_v9 }
 0x406   :  { %1407 = vpow2.f32 %v677_v10 }
 0x40f   :  { %v1406_v11 = vpop.eup %1405 }
 0x410   :  { %v679_v12 = vsel %vm666_vm14, %v1406_v11, 0.0 }
 0x411   :  { %680 = vadd.xlane.f32.xlu0 %v679_v12 }
 0x413   :  { %v1408_v13 = vpop.eup %1407 }
 0x414   :  { %v682_v14 = vsel %vm666_vm14, %v1408_v13, 0.0 }
 0x415   :  { %683 = vadd.xlane.f32.xlu1 %v682_v14 }
 0x434   :  { %v967_v16 = vpop.f32.mrf.mxu1 }
 0x436   :  { %v1297_v17 = vpop.f32.mrf.mxu1 }
 0x438   :  { %v970_v18 = vpop.f32.mrf.mxu1 }
 0x43a   :  { %v1298_v19 = vpop.f32.mrf.mxu1 }
 0x49a   :  { %v681_v20 = vpop.xlane.xlu0 %680 }
 0x49b   :  { %1409 = vrcp.f32 %v681_v20 }
 0x49e   :  { %v684_v21 = vpop.xlane.xlu1 %683 }
 0x49f   :  { %1411 = vrcp.f32 %v684_v21 }
 0x4a0   :  { %1413 = vrcp.f32 %v967_v16 }
 0x4a1   :  { %1415 = vrcp.f32 %v970_v18 }
 0x4a8   :  { %v1410_v22 = vpop.eup %1409 }
 0x4a9   :  { %v687_v23 = vmul.f32 %v1410_v22, %v1406_v11 }
 0x4ac   :  { %v1412_v24 = vpop.eup %1411 }
 0x4ad   :  { %v1414_v25 = vpop.eup %1413  ;;  %v688_v26 = vmul.f32 %v1412_v24, %v1408_v13 }
 0x4ae   :  { %v1416_v27 = vpop.eup %1415  ;;  %v976_v51 = vmul.f32 %v1414_v25, %v687_v23 }
 0x4af   :  { %v977_v28 = vmul.f32 %v1416_v27, %v688_v26 }
 0x4b1   :  { %v978_v30 = vpack.c.bf16 %v977_v28, %v976_v51 }
 0x4b3   :  { %1302 = vmatmul.mubr.msk.bf16.vlgmr.msra.gmra.mxu0 %vm666_vm14, %v978_v30 }
 0x4b4   :  { %1306 = vmatpush3.bf16.msra.mxu0 %v1397_v29  ;;  %1313 = vmatprep.mubr.msk.bf16.mxu0 %vm1554_vm1, %v1553_v59 }
 0x4b5   :  { %1307 = vmatprep.subr.bf16.mxu0 %v1553_v59 }
 0x4b8   :  { %1308 = vmatpush3.bf16.msra.mxu0 %v1398_v31 }
 0x4b9   :  { %1309 = vmatprep.subr.bf16.mxu0 %v1553_v59 }
 0x4bc   :  { %1310 = vmatpush3.bf16.msra.mxu0 %v1399_v32 }
 0x4bd   :  { %1311 = vmatprep.subr.bf16.mxu0 %v1553_v59 }
 0x4c0   :  { %1312 = vmatpush3.bf16.msra.mxu0 %v1400_v36 }
 0x573   :  { %v1020_v37 = vpop.f32.mrf.mxu0 }
 0x574   :  { %v1027_v40 = vmul.f32 %v1885_v61, %v1020_v37 }
 0x575   :  { %v1303_v38 = vpop.f32.mrf.mxu0 }
 0x577   :  { %v1023_v39 = vpop.f32.mrf.mxu0 }
 0x578   :  { %v1028_v41 = vmul.f32 %v1883_v58, %v1023_v39 }
 0x579   :  { %v1304_v42 = vpop.f32.mrf.mxu0 }
 0x57a   :  { %v1029_v43 = vpack.c.bf16 %v1028_v41, %v1027_v40 }
 0x57c   :  { %1314 = vmatmul.mubr.msk.bf16.vlgmr.msra.gmra.mxu0 %vm813_vm11, %v1029_v43 }
 0x63c   :  { %v1099_v44 = vpop.f32.mrf.mxu0 }
 0x63d   :  { %1106 = vst [vmem:[#allocation11] sm:$0xff] %v1099_v44 }
 0x63e   :  { %v1315_v45 = vpop.f32.mrf.mxu0 }
 0x640   :  { %v1102_v59 = vpop.f32.mrf.mxu0 }
 0x641   :  { %1107 = vst [vmem:[#allocation11 + $0x8] sm:$0xff] %v1102_v59 }
 0x642   :  { %v1316_v35 = vpop.f32.mrf.mxu0 }
 0x643   :  { %1528 = shalt.err (!%p1525_p1)
}
 0x644   :  { %s1556_s16 = smov 128   ;;  %s1557_s17 = smov 8  }
 0x645   :  { %1119 = dma.vmem_to_hbm [thread:$0]  %s1114_s6, 256, %s1922_s14, [#allocation4], %s1556_s16, %s1556_s16, %s1557_s17  }
 0x646   :  { %1543 = dma.done.wait [#allocation4], 256  }
 0x647   :  { %1544 = vsyncadd [#allocation4], 4294967040 }
 0x648   :  { %1123 = vsyncpa [#allocation3], 1 }
 0x649   :  { %1124 = vsyncpa [#allocation6], 1 }
 0x64a   :  { %1125 = vsyncpa [#allocation9], 1 }
 0x64b   :  { %1126 = vsyncpa [#allocation4], 1 }

</bundles_post_ra>
